<compile_context>
chip_gen: v7x
topology: tpu7x:2x2x1
jax: 0.10.0
libtpu: 0.0.40
codegen_flags: <defaults>
</compile_context>

<pallas_src>
import functools

import jax
import jax.numpy as jnp
from jax.experimental import pallas as pl
from jax.experimental.pallas import tpu as pltpu


def _round_up(x, m):
    return (x + m - 1) // m * m


def _ffn_kernel(seed_ref, x_ref, w1_ref, b1_ref, w2_ref, b2_ref, o_ref, *,
                dropout_rate, training):
    # First matmul: feed the MXU in the storage dtype (bf16 stays bf16), f32 accumulate.
    x = x_ref[...]
    h = jnp.dot(x, w1_ref[...], preferred_element_type=jnp.float32)
    h = h + b1_ref[...].astype(jnp.float32)          # b1 broadcast over rows
    h = jnp.maximum(h, 0.0)                          # ReLU

    if training and dropout_rate > 0.0:
        # TODO(synk): torch RNG stream cannot be reproduced; uses the TPU hardware PRNG.
        # Seeded per grid step so it is safe under megacore sharding; mask therefore
        # depends on the row tile size.
        pltpu.prng_seed(seed_ref[0] + pl.program_id(0))
        bits = pltpu.bitcast(pltpu.prng_random_bits(h.shape), jnp.uint32)
        thresh = jnp.uint32(int(dropout_rate * float(2**32 - 1)))
        keep = bits >= thresh                        # unsigned compare, keep prob ~= 1-p
        h = jnp.where(keep, h * (1.0 / (1.0 - dropout_rate)), 0.0)

    # Second matmul: cast activation back to the storage dtype so bf16 inputs use the
    # MXU natively; f32 inputs stay f32.
    y = jnp.dot(h.astype(x_ref.dtype), w2_ref[...],
                preferred_element_type=jnp.float32)
    y = y + b2_ref[...].astype(jnp.float32)          # b2 broadcast over rows
    o_ref[...] = y.astype(o_ref.dtype)


def positionwise_ffn(x, w1, b1, w2, b2, *, dropout_rate=0.0, training=False,
                     seed=0, tm=256):
    """x: (..., n_hiddens). w1: (n_hiddens, f_hiddens). w2: (f_hiddens, n_hiddens)."""
    orig_shape = x.shape
    n_hiddens, f_hiddens = w1.shape
    assert w2.shape == (f_hiddens, n_hiddens)
    assert b1.shape == (f_hiddens,) and b2.shape == (n_hiddens,)

    x2 = x.reshape(-1, n_hiddens)
    M = x2.shape[0]

    # Lane-dense feature dims: pad to multiples of 128 so the MXU lanes are full and
    # output stores are unmasked full-lane vst.
    n_pad = _round_up(n_hiddens, 128)
    f_pad = _round_up(f_hiddens, 128)

    # Row tile: large enough to saturate the MXU M dimension; shrink for tiny inputs
    # and pad the row count so no divisibility constraint is imposed on callers.
    tm = _round_up(min(tm, _round_up(M, 8)), 8)
    M_pad = _round_up(M, tm)

    dtype = x.dtype
    x_p = jnp.zeros((M_pad, n_pad), dtype).at[:M, :n_hiddens].set(x2)
    w1_p = jnp.zeros((n_pad, f_pad), w1.dtype).at[:n_hiddens, :f_hiddens].set(w1)
    b1_p = jnp.zeros((1, f_pad), b1.dtype).at[0, :f_hiddens].set(b1)
    w2_p = jnp.zeros((f_pad, n_pad), w2.dtype).at[:f_hiddens, :n_hiddens].set(w2)
    b2_p = jnp.zeros((1, n_pad), b2.dtype).at[0, :n_hiddens].set(b2)
    seed_arr = jnp.array([seed], dtype=jnp.int32)

    kernel = functools.partial(_ffn_kernel, dropout_rate=dropout_rate,
                               training=training)

    # Scoped-VMEM budget: x/out tiles (double-buffered), resident weights/biases
    # (default 2-deep buffering), plus the f32 intermediate and dropout bits.
    itemsize = jnp.dtype(dtype).itemsize
    w_itemsize = jnp.dtype(w1.dtype).itemsize
    est = (
        2 * tm * n_pad * itemsize                                   # x tiles
        + 2 * tm * n_pad * itemsize                                 # out tiles
        + 2 * (n_pad * f_pad + f_pad * n_pad + f_pad + n_pad) * w_itemsize
        + 2 * tm * f_pad * 4                                        # h (+ dropout bits)
    )
    # Demo shapes land at the 32 MiB floor; the 100 MiB ceiling is only reachable on
    # v5e/v6e (128 MiB physical). For very large FFNs on v7x, tile f_hiddens instead.
    vmem_limit = max(32 * 1024 * 1024, min(int(est * 1.5), 100 * 1024 * 1024))

    out = pl.pallas_call(
        kernel,
        out_shape=jax.ShapeDtypeStruct((M_pad, n_pad), dtype),
        grid_spec=pltpu.PrefetchScalarGridSpec(
            num_scalar_prefetch=1,                      # dropout seed in SMEM
            grid=(M_pad // tm,),
            in_specs=[
                pl.BlockSpec((tm, n_pad), lambda i, seed: (i, 0)),        # x rows
                pl.BlockSpec((n_pad, f_pad), lambda i, seed: (0, 0)),      # w1 (resident)
                pl.BlockSpec((1, f_pad), lambda i, seed: (0, 0)),          # b1
                pl.BlockSpec((f_pad, n_pad), lambda i, seed: (0, 0)),      # w2 (resident)
                pl.BlockSpec((1, n_pad), lambda i, seed: (0, 0)),          # b2
            ],
            out_specs=pl.BlockSpec((tm, n_pad), lambda i, seed: (i, 0)),
        ),
        compiler_params=pltpu.CompilerParams(
            dimension_semantics=("parallel",),
            vmem_limit_bytes=vmem_limit,
        ),
    )(seed_arr, x_p, w1_p, b1_p, w2_p, b2_p)

    return out[:M, :n_hiddens].reshape(orig_shape)


def _init_linear(key, fan_in, fan_out, dtype=jnp.float32):
    # torch.nn.Linear default init: U(-1/sqrt(fan_in), 1/sqrt(fan_in))
    kw, kb = jax.random.split(key)
    bound = 1.0 / (fan_in ** 0.5)
    # weight stored already transposed: (fan_in, fan_out)
    w = jax.random.uniform(kw, (fan_in, fan_out), dtype, -bound, bound)
    b = jax.random.uniform(kb, (fan_out,), dtype, -bound, bound)
    return w, b


if __name__ == "__main__":
    batch, seq = 2, 8
    n_hiddens, f_hiddens = 32, 64
    dropout = 0.1  # forward is evaluated in eval mode -> dropout is identity

    key = jax.random.PRNGKey(0)
    kx, k1, k2 = jax.random.split(key, 3)

    x = jax.random.normal(kx, (batch, seq, n_hiddens), jnp.float32)
    w1, b1 = _init_linear(k1, n_hiddens, f_hiddens)
    w2, b2 = _init_linear(k2, f_hiddens, n_hiddens)

    y = positionwise_ffn(x, w1, b1, w2, b2, dropout_rate=dropout, training=False)
    y = jax.block_until_ready(y)

    # Pure-JAX reference (eval-mode forward).
    h_ref = jnp.maximum(x @ w1 + b1, 0.0)
    y_ref = h_ref @ w2 + b2

    assert y.shape == x.shape
    assert jnp.allclose(y, y_ref, atol=1e-5, rtol=1e-5), "mismatch vs reference"
    print("KERNEL_OK")
</pallas_src>

<mosaic_0001>
module attributes {stable_mosaic.version = 11 : i64} {
  func.func @_ffn_kernel(%arg0: i32, %arg1: memref<1xi32, #tpu.memory_space<smem>>, %arg2: memref<16x128xf32, #tpu.memory_space<vmem>>, %arg3: memref<128x128xf32, #tpu.memory_space<vmem>>, %arg4: memref<1x128xf32, #tpu.memory_space<vmem>>, %arg5: memref<128x128xf32, #tpu.memory_space<vmem>>, %arg6: memref<1x128xf32, #tpu.memory_space<vmem>>, %arg7: memref<16x128xf32, #tpu.memory_space<vmem>>) attributes {dimension_semantics = [#tpu.dimension_semantics<parallel>], iteration_bounds = array<i64: 1>, scalar_prefetch = 1 : i64, scratch_operands = 0 : i64, tpu.core_type = #tpu.core_type<tc>, window_params = [{transform_indices = @transform_0, window_bounds = array<i64: 16, 128>}, {pipeline_mode = #tpu.pipeline_mode<synchronous>, transform_indices = @transform_1, window_bounds = array<i64: 128, 128>}, {pipeline_mode = #tpu.pipeline_mode<synchronous>, transform_indices = @transform_2, window_bounds = array<i64: 1, 128>}, {pipeline_mode = #tpu.pipeline_mode<synchronous>, transform_indices = @transform_3, window_bounds = array<i64: 128, 128>}, {pipeline_mode = #tpu.pipeline_mode<synchronous>, transform_indices = @transform_4, window_bounds = array<i64: 1, 128>}, {transform_indices = @transform_5, window_bounds = array<i64: 16, 128>}]} {
    %c0 = arith.constant 0 : index
    %c0_0 = arith.constant 0 : index
    %0 = vector.load %arg2[%c0, %c0_0] : memref<16x128xf32, #tpu.memory_space<vmem>>, vector<16x128xf32>
    %c0_1 = arith.constant 0 : index
    %c0_2 = arith.constant 0 : index
    %1 = vector.load %arg3[%c0_1, %c0_2] : memref<128x128xf32, #tpu.memory_space<vmem>>, vector<128x128xf32>
    %cst = arith.constant dense<0.000000e+00> : vector<16x128xf32>
    %2 = tpu.matmul %0, %1, %cst {dimension_numbers = #tpu.dot_dimension_numbers<[1], [0], [0], [1], [0, 0, 1, 1], [], []>} : vector<16x128xf32>, vector<128x128xf32>, vector<16x128xf32> -> vector<16x128xf32>
    %c0_3 = arith.constant 0 : index
    %c0_4 = arith.constant 0 : index
    %3 = vector.load %arg4[%c0_3, %c0_4] : memref<1x128xf32, #tpu.memory_space<vmem>>, vector<1x128xf32>
    %4 = vector.broadcast %3 : vector<1x128xf32> to vector<16x128xf32>
    %5 = arith.addf %2, %4 : vector<16x128xf32>
    %cst_5 = arith.constant 0.000000e+00 : f32
    %6 = vector.broadcast %cst_5 : f32 to vector<16x128xf32>
    %7 = arith.maximumf %5, %6 : vector<16x128xf32>
    %c0_6 = arith.constant 0 : index
    %c0_7 = arith.constant 0 : index
    %8 = vector.load %arg5[%c0_6, %c0_7] : memref<128x128xf32, #tpu.memory_space<vmem>>, vector<128x128xf32>
    %cst_8 = arith.constant dense<0.000000e+00> : vector<16x128xf32>
    %9 = tpu.matmul %7, %8, %cst_8 {dimension_numbers = #tpu.dot_dimension_numbers<[1], [0], [0], [1], [0, 0, 1, 1], [], []>} : vector<16x128xf32>, vector<128x128xf32>, vector<16x128xf32> -> vector<16x128xf32>
    %c0_9 = arith.constant 0 : index
    %c0_10 = arith.constant 0 : index
    %10 = vector.load %arg6[%c0_9, %c0_10] : memref<1x128xf32, #tpu.memory_space<vmem>>, vector<1x128xf32>
    %11 = vector.broadcast %10 : vector<1x128xf32> to vector<16x128xf32>
    %12 = arith.addf %9, %11 : vector<16x128xf32>
    %c0_11 = arith.constant 0 : index
    %c0_12 = arith.constant 0 : index
    %13 = vector.load %arg7[%c0_11, %c0_12] : memref<16x128xf32, #tpu.memory_space<vmem>>, vector<16x128xf32>
    tpu.vector_store %arg7[%c0_11, %c0_12], %12 {strides = array<i32>} : memref<16x128xf32, #tpu.memory_space<vmem>>, vector<16x128xf32>,
    return
  }
  func.func @transform_0(%arg0: i32, %arg1: memref<1xi32, #tpu.memory_space<smem>>) -> (i32, i32) {
    %c0_i32 = arith.constant 0 : i32
    %c0_i32_0 = arith.constant 0 : i32
    return %arg0, %c0_i32 : i32, i32
  }
  func.func @transform_1(%arg0: i32, %arg1: memref<1xi32, #tpu.memory_space<smem>>) -> (i32, i32) {
    %c0_i32 = arith.constant 0 : i32
    %c0_i32_0 = arith.constant 0 : i32
    %c0_i32_1 = arith.constant 0 : i32
    return %c0_i32, %c0_i32_0 : i32, i32
  }
  func.func @transform_2(%arg0: i32, %arg1: memref<1xi32, #tpu.memory_space<smem>>) -> (i32, i32) {
    %c0_i32 = arith.constant 0 : i32
    %c0_i32_0 = arith.constant 0 : i32
    %c0_i32_1 = arith.constant 0 : i32
    return %c0_i32, %c0_i32_0 : i32, i32
  }
  func.func @transform_3(%arg0: i32, %arg1: memref<1xi32, #tpu.memory_space<smem>>) -> (i32, i32) {
    %c0_i32 = arith.constant 0 : i32
    %c0_i32_0 = arith.constant 0 : i32
    %c0_i32_1 = arith.constant 0 : i32
    return %c0_i32, %c0_i32_0 : i32, i32
  }
  func.func @transform_4(%arg0: i32, %arg1: memref<1xi32, #tpu.memory_space<smem>>) -> (i32, i32) {
    %c0_i32 = arith.constant 0 : i32
    %c0_i32_0 = arith.constant 0 : i32
    %c0_i32_1 = arith.constant 0 : i32
    return %c0_i32, %c0_i32_0 : i32, i32
  }
  func.func @transform_5(%arg0: i32, %arg1: memref<1xi32, #tpu.memory_space<smem>>) -> (i32, i32) {
    %c0_i32 = arith.constant 0 : i32
    %c0_i32_0 = arith.constant 0 : i32
    return %arg0, %c0_i32 : i32, i32
  }
}

</mosaic_0001>

<bundles_post_ra>
// kernel: tpu_custom_call.1
= control target key start
LH: loop header
LB: loop body
LE: loop exit
PB: predicated region body
PF: predicated region fallthrough
CT: control target
= control target key end

     0   :  { %12 = vsyncpa [#allocation5], 0  ;;  %s670_s0 = inlined_call_operand.<no memory space> [shape: s32[1], index: 0, kind: input, shape index: {}]   ;;  %s671_s1 = inlined_call_operand.hbm [shape: f32[16,128], index: 1, kind: input, shape index: {}]   ;;  %s672_s2 = inlined_call_operand.hbm [shape: f32[128,128], index: 2, kind: input, shape index: {}]   ;;  %s673_s3 = inlined_call_operand.vmem [shape: f32[1,128], index: 3, kind: input, shape index: {}]   ;;  %s674_s4 = inlined_call_operand.hbm [shape: f32[128,128], index: 4, kind: input, shape index: {}]   ;;  %s675_s5 = inlined_call_operand.vmem [shape: f32[1,128], index: 5, kind: input, shape index: {}]   ;;  %s676_s6 = inlined_call_operand.hbm [shape: f32[16,128], index: 6, kind: output, shape index: {}]  }
   0x1   :  { %13 = vsyncpa [#allocation8], 0 }
   0x2   :  { %14 = vsyncpa [#allocation6], 0  ;;  %s556_s0 = smov [#allocation7]   ;;  %s557_s22 = smov [#allocation4]  }
   0x3   :  { %s32_s21 = sshll.u32 %s556_s0, 4  ;;  %s20_s23 = sshll.u32 %s557_s22, 4  ;;  %s33_s21 = int_to_ptr.vmem [resolvable:$true] %s32_s21  ;;  %s597_s23 = int_to_ptr.vmem [resolvable:$true] %s20_s23 }
   0x4   :  { %s462_s26 = scalar_lea.hbm %s672_s2, 2048 }
   0x5   :  { %p463_p0 = scmp.ne.s32.totalorder %s672_s2, %s462_s26  ;;  %p466_p1 = scmp.lt.u32.totalorder %s462_s26, %s672_s2 }
   0x7   :  { %p468_p2 = pnand %p466_p1, %p463_p0 }
   0x9   :  { %471 = shalt.err (!%p468_p2)
}
   0xa   :  { %s472_s7 = scalar_lea.vmem %s33_s21, 2048  ;;  %p477_p4 = scmp.lt.s32.totalorder %s33_s21, %s33_s21 }
   0xb   :  { %p473_p3 = scmp.ne.s32.totalorder %s33_s21, %s472_s7  ;;  %p478_p5 = scmp.lt.s32.totalorder %s472_s7, %s472_s7 }
   0xd   :  { %p479_p6 = por %p478_p5, %p477_p4 }
   0xf   :  { %p480_p7 = pnand %p479_p6, %p473_p3 }
  0x11   :  { %483 = shalt.err (!%p480_p7)
}
  0x12   :  { %s558_s8 = smov 128   ;;  %s559_s9 = smov 8  }
  0x13   :  { %38 = dma.hbm_to_vmem [thread:$0]  %s672_s2, 2048, %s33_s21, [#allocation8], %s558_s8, %s558_s8, %s559_s9  }
  0x14   :  { %s484_s14 = scalar_lea.hbm %s671_s1, 256 }
  0x15   :  { %p485_p8 = scmp.ne.s32.totalorder %s671_s1, %s484_s14  ;;  %p488_p9 = scmp.lt.u32.totalorder %s484_s14, %s671_s1 }
  0x17   :  { %p490_p10 = pnand %p488_p9, %p485_p8 }
  0x19   :  { %493 = shalt.err (!%p490_p10)
}
  0x1a   :  { %s494_s19 = scalar_lea.vmem %s597_s23, 256  ;;  %p499_p12 = scmp.lt.s32.totalorder %s597_s23, %s597_s23 }
  0x1b   :  { %p495_p11 = scmp.ne.s32.totalorder %s597_s23, %s494_s19  ;;  %p500_p13 = scmp.lt.s32.totalorder %s494_s19, %s494_s19 }
  0x1d   :  { %p501_p0 = por %p500_p13, %p499_p12 }
  0x1f   :  { %p502_p1 = pnand %p501_p0, %p495_p11 }
  0x21   :  { %505 = shalt.err (!%p502_p1)
}
  0x22   :  { %26 = dma.hbm_to_vmem [thread:$0]  %s671_s1, 256, %s597_s23, [#allocation5], %s558_s8, %s558_s8, %s559_s9  }
  0x23   :  { %s560_s0 = smov [#allocation9]   ;;  %s506_s25 = scalar_lea.hbm %s674_s4, 2048 }
  0x24   :  { %s46_s21 = sshll.u32 %s560_s0, 4  ;;  %p507_p2 = scmp.ne.s32.totalorder %s674_s4, %s506_s25  ;;  %s47_s21 = int_to_ptr.vmem [resolvable:$true] %s46_s21 }
  0x25   :  { %p510_p3 = scmp.lt.u32.totalorder %s506_s25, %s674_s4 }
  0x27   :  { %p512_p4 = pnand %p510_p3, %p507_p2 }
  0x29   :  { %515 = shalt.err (!%p512_p4)
}
  0x2a   :  { %s516_s30 = scalar_lea.vmem %s47_s21, 2048  ;;  %p521_p6 = scmp.lt.s32.totalorder %s47_s21, %s47_s21 }
  0x2b   :  { %p517_p5 = scmp.ne.s32.totalorder %s47_s21, %s516_s30  ;;  %p522_p7 = scmp.lt.s32.totalorder %s516_s30, %s516_s30 }
  0x2d   :  { %p523_p8 = por %p522_p7, %p521_p6 }
  0x2f   :  { %p524_p9 = pnand %p523_p8, %p517_p5 }
  0x31   :  { %527 = shalt.err (!%p524_p9)
}
  0x32   :  { %52 = dma.hbm_to_vmem [thread:$0]  %s674_s4, 2048, %s47_s21, [#allocation8], %s558_s8, %s558_s8, %s559_s9  }
  0x33   :  { %550 = dma.done.wait [#allocation5], 256  }
  0x34   :  { %551 = vsyncadd [#allocation5], 4294967040 }
  0x35   :  { %552 = dma.done.wait [#allocation8], 4096  }
  0x36   :  { %553 = vsyncadd [#allocation8], 4294963200  ;;  %v66_v0 = vld [vmem:[#allocation7] sm:$0xff]  ;;  %v67_v1 = vld [vmem:[#allocation7 + $0x8] sm:$0xff]  ;;  %s561_s12 = smov [#allocation10]  }
  0x37   :  { %v68_v2 = vld [vmem:[#allocation7 + $0x10] sm:$0xff]  ;;  %v392_v3 = vpack.c.bf16 %v67_v1, %v66_v0  ;;  %v69_v4 = vld [vmem:[#allocation7 + $0x18] sm:$0xff]  ;;  %v70_v6 = vld [vmem:[#allocation7 + $0x20] sm:$0xff]  ;;  %s271_s13 = sshll.u32 %s561_s12, 4  ;;  %s272_s13 = int_to_ptr.vmem [resolvable:$true] %s271_s13 }
  0x38   :  { %v396_v5 = vpack.c.bf16 %v69_v4, %v68_v2  ;;  %v71_v7 = vld [vmem:[#allocation7 + $0x28] sm:$0xff]  ;;  %v72_v9 = vld [vmem:[#allocation7 + $0x30] sm:$0xff]  ;;  %v73_v10 = vld [vmem:[#allocation7 + $0x38] sm:$0xff]  ;;  %p533_p11 = scmp.lt.s32.totalorder %s272_s13, %s272_s13 }
  0x39   :  { %393 = vmatprep.subr.bf16.mxu0 %v392_v3  ;;  %v400_v8 = vpack.c.bf16 %v71_v7, %v70_v6  ;;  %v64_v11 = vld [vmem:[#allocation4] sm:$0xff]  ;;  %v166_v12 = vld [vmem:[#allocation9] sm:$0xff]  ;;  %v167_v13 = vld [vmem:[#allocation9 + $0x8] sm:$0xff]  ;;  %v404_v20 = vpack.c.bf16 %v73_v10, %v72_v9 }
  0x3a   :  { %395 = vmatpush3.bf16.msra.mxu0 %v392_v3  ;;  %354 = vmatprep.mubr.f32.mxu0 %v64_v11  ;;  %v168_v14 = vld [vmem:[#allocation9 + $0x10] sm:$0xff]  ;;  %v424_v15 = vpack.c.bf16 %v167_v13, %v166_v12  ;;  %v169_v16 = vld [vmem:[#allocation9 + $0x18] sm:$0xff]  ;;  %v170_v18 = vld [vmem:[#allocation9 + $0x20] sm:$0xff] }
  0x3b   :  { %397 = vmatprep.subr.bf16.mxu0 %v396_v5  ;;  %v428_v17 = vpack.c.bf16 %v169_v16, %v168_v14  ;;  %v171_v19 = vld [vmem:[#allocation9 + $0x28] sm:$0xff]  ;;  %v74_v21 = vld [vmem:[#allocation7 + $0x40] sm:$0xff]  ;;  %v172_v24 = vld [vmem:[#allocation9 + $0x30] sm:$0xff] }
  0x3c   :  { %425 = vmatprep.subr.bf16.mxu1 %v424_v15  ;;  %v75_v22 = vld [vmem:[#allocation7 + $0x48] sm:$0xff]  ;;  %v432_v23 = vpack.c.bf16 %v171_v19, %v170_v18  ;;  %v173_v25 = vld [vmem:[#allocation9 + $0x38] sm:$0xff]  ;;  %v76_v27 = vld [vmem:[#allocation7 + $0x50] sm:$0xff] }
  0x3d   :  { %427 = vmatpush3.bf16.msra.mxu1 %v424_v15  ;;  %v408_v26 = vpack.c.bf16 %v75_v22, %v74_v21  ;;  %v77_v28 = vld [vmem:[#allocation7 + $0x58] sm:$0xff]  ;;  %v436_v29 = vpack.c.bf16 %v173_v25, %v172_v24  ;;  %v174_v30 = vld [vmem:[#allocation9 + $0x40] sm:$0xff]  ;;  %v175_v31 = vld [vmem:[#allocation9 + $0x48] sm:$0xff] }
  0x3e   :  { %399 = vmatpush3.bf16.msra.mxu0 %v396_v5  ;;  %429 = vmatprep.subr.bf16.mxu1 %v428_v17  ;;  %v412_v32 = vpack.c.bf16 %v77_v28, %v76_v27  ;;  %v78_v33 = vld [vmem:[#allocation7 + $0x60] sm:$0xff]  ;;  %v79_v34 = vld [vmem:[#allocation7 + $0x68] sm:$0xff]  ;;  %v440_v35 = vpack.c.bf16 %v175_v31, %v174_v30  ;;  %v176_v36 = vld [vmem:[#allocation9 + $0x50] sm:$0xff] }
  0x3f   :  { %401 = vmatprep.subr.bf16.mxu0 %v400_v8  ;;  %v177_v37 = vld [vmem:[#allocation9 + $0x58] sm:$0xff]  ;;  %v416_v38 = vpack.c.bf16 %v79_v34, %v78_v33  ;;  %v80_v39 = vld [vmem:[#allocation7 + $0x70] sm:$0xff]  ;;  %v178_v42 = vld [vmem:[#allocation9 + $0x60] sm:$0xff] }
  0x40   :  { %v81_v40 = vld [vmem:[#allocation7 + $0x78] sm:$0xff]  ;;  %v444_v41 = vpack.c.bf16 %v177_v37, %v176_v36  ;;  %v179_v43 = vld [vmem:[#allocation9 + $0x68] sm:$0xff]  ;;  %v180_v47 = vld [vmem:[#allocation9 + $0x70] sm:$0xff] }
  0x41   :  { %431 = vmatpush3.bf16.msra.mxu1 %v428_v17  ;;  %v420_v44 = vpack.c.bf16 %v81_v40, %v80_v39  ;;  %v448_v45 = vpack.c.bf16 %v179_v43, %v178_v42  ;;  %v65_v46 = vld [vmem:[#allocation4 + $0x8] sm:$0xff]  ;;  %v284_v50 = vld [vmem:[%s673_s3] ss:$0 sm:$0xff]  ;;  %s528_s3 = scalar_lea.vmem %s272_s13, 256 }
  0x42   :  { %403 = vmatpush3.bf16.msra.mxu0 %v400_v8  ;;  %433 = vmatprep.subr.bf16.mxu1 %v432_v23  ;;  %v181_v48 = vld [vmem:[#allocation9 + $0x78] sm:$0xff]  ;;  %v285_v57 = vld [vmem:[%s675_s5] ss:$0 sm:$0xff]  ;;  %p529_p10 = scmp.ne.s32.totalorder %s272_s13, %s528_s3  ;;  %p534_p12 = scmp.lt.s32.totalorder %s528_s3, %s528_s3 }
  0x43   :  { %405 = vmatprep.subr.bf16.mxu0 %v404_v20  ;;  %v452_v49 = vpack.c.bf16 %v181_v48, %v180_v47 }
  0x44   :  { %p535_p13 = por %p534_p12, %p533_p11 }
  0x45   :  { %435 = vmatpush3.bf16.msra.mxu1 %v432_v23 }
  0x46   :  { %407 = vmatpush3.bf16.msra.mxu0 %v404_v20  ;;  %437 = vmatprep.subr.bf16.mxu1 %v436_v29  ;;  %p536_p0 = pnand %p535_p13, %p529_p10 }
  0x47   :  { %409 = vmatprep.subr.bf16.mxu0 %v408_v26 }
  0x49   :  { %439 = vmatpush3.bf16.msra.mxu1 %v436_v29 }
  0x4a   :  { %411 = vmatpush3.bf16.msra.mxu0 %v408_v26  ;;  %441 = vmatprep.subr.bf16.mxu1 %v440_v35 }
  0x4b   :  { %413 = vmatprep.subr.bf16.mxu0 %v412_v32 }
  0x4d   :  { %443 = vmatpush3.bf16.msra.mxu1 %v440_v35 }
  0x4e   :  { %415 = vmatpush3.bf16.msra.mxu0 %v412_v32  ;;  %445 = vmatprep.subr.bf16.mxu1 %v444_v41 }
  0x4f   :  { %417 = vmatprep.subr.bf16.mxu0 %v416_v38 }
  0x51   :  { %447 = vmatpush3.bf16.msra.mxu1 %v444_v41 }
  0x52   :  { %419 = vmatpush3.bf16.msra.mxu0 %v416_v38  ;;  %449 = vmatprep.subr.bf16.mxu1 %v448_v45 }
  0x53   :  { %421 = vmatprep.subr.bf16.mxu0 %v420_v44 }
  0x55   :  { %451 = vmatpush3.bf16.msra.mxu1 %v448_v45 }
  0x56   :  { %423 = vmatpush3.bf16.msra.mxu0 %v420_v44  ;;  %453 = vmatprep.subr.bf16.mxu1 %v452_v49 }
  0x59   :  { %355 = vmatmul.mubr.f32.vlgmr.msra.gmra.mrb[0].mxu0 %v65_v46  ;;  %455 = vmatpush3.bf16.msra.mxu1 %v452_v49 }
 0x12c   :  { %v356_v51 = vpop.f32.mrb[0].mxu0 }
 0x12d   :  { %v161_v52 = vadd.f32 %v356_v51, %v284_v50  ;;  %v155_v53 = vpop.f32.mrb[1].mxu0 }
 0x12e   :  { %v156_v54 = vadd.f32 %v284_v50, %v155_v53 }
 0x12f   :  { %v165_v56 = vmax.f32 %v161_v52, 0.0 }
 0x130   :  { %v164_v55 = vmax.f32 %v156_v54, 0.0 }
 0x132   :  { %389 = vmatprep.mubr.f32.mxu1 %v164_v55 }
 0x133   :  { %390 = vmatmul.mubr.f32.vlgmr.msra.gmra.mrb[0].mxu1 %v165_v56 }
 0x206   :  { %v391_v58 = vpop.f32.mrb[0].mxu1 }
 0x207   :  { %v261_v59 = vadd.f32 %v391_v58, %v285_v57  ;;  %v255_v60 = vpop.f32.mrb[1].mxu1 }
 0x208   :  { %v256_v61 = vadd.f32 %v285_v57, %v255_v60 }
 0x209   :  { %265 = vst [vmem:[#allocation10 + $0x8] sm:$0xff] %v261_v59 }
 0x20a   :  { %264 = vst [vmem:[#allocation10] sm:$0xff] %v256_v61 }
 0x20b   :  { %539 = shalt.err (!%p536_p0)
}
 0x20c   :  { %s540_s5 = scalar_lea.hbm %s676_s6, 256 }
 0x20d   :  { %p541_p1 = scmp.ne.s32.totalorder %s676_s6, %s540_s5  ;;  %p544_p2 = scmp.lt.u32.totalorder %s540_s5, %s676_s6 }
 0x20f   :  { %p546_p3 = pnand %p544_p2, %p541_p1 }
 0x211   :  { %549 = shalt.err (!%p546_p3)
}
 0x212   :  { %277 = dma.vmem_to_hbm [thread:$0]  %s272_s13, 256, %s676_s6, [#allocation6], %s558_s8, %s558_s8, %s559_s9  }
 0x213   :  { %554 = dma.done.wait [#allocation6], 256  }
 0x214   :  { %555 = vsyncadd [#allocation6], 4294967040 }
 0x215   :  { %281 = vsyncpa [#allocation5], 1 }
 0x216   :  { %282 = vsyncpa [#allocation8], 1 }
 0x217   :  { %283 = vsyncpa [#allocation6], 1 }

</bundles_post_ra>
